<compile_context>
chip_gen: v6e
topology: v6e:2x2x1
jax: 0.10.0
libtpu: 0.0.40
codegen_flags: <defaults>
</compile_context>

<pallas_src>
import functools
import math

import jax
import jax.numpy as jnp
from jax.experimental import pallas as pl
from jax.experimental.pallas import tpu as pltpu

N_BITS = 8
QMAX = float(2 ** N_BITS - 1)  # 255.0
CLIP_MIN = 1e-5

# Tiling knobs. Worst case f32 live set (512x512 tiles, double-buffered inputs/
# output + accumulator) is ~7 MiB -> fits the 32 MiB default scoped VMEM on
# v5e/v6e and on v7x (64 MiB physical) with large headroom.
_MAX_TM, _MAX_TN, _MAX_TK = 512, 512, 512
_FQ_COLS = 512        # lane-dense elementwise / reduction tiles
_FQ_MAX_ROWS = 1024


def _cdiv(a, b):
    return -(-a // b)


def _round_up(a, b):
    return _cdiv(a, b) * b


def _pad_tile(dim, align, max_tile):
    """Return (padded_dim, tile) with tile % align == 0 and padded_dim % tile == 0."""
    p = _round_up(dim, align)
    t = min(p, max_tile)
    return _round_up(dim, t), t


# ----------------------------- Pallas kernels ------------------------------ #

def _minmax_kernel(x_ref, min_ref, max_ref):
    """Tiled per-tensor min/max reduction; (1,1) output blocks stay resident."""
    @pl.when(pl.program_id(0) == 0)
    def _():
        min_ref[...] = jnp.full((1, 1), jnp.inf, dtype=jnp.float32)
        max_ref[...] = jnp.full((1, 1), -jnp.inf, dtype=jnp.float32)

    x = x_ref[...].astype(jnp.float32)
    min_ref[...] = jnp.minimum(min_ref[...], jnp.min(x, keepdims=True))
    max_ref[...] = jnp.maximum(max_ref[...], jnp.max(x, keepdims=True))


def _fakequant_kernel(qp_ref, x_ref, o_ref):
    """Uniform-affine fake quant; qp_ref (SMEM) = [scale, 1/scale, zero_point]."""
    scale, inv_scale, zp = qp_ref[0], qp_ref[1], qp_ref[2]
    x = x_ref[...].astype(jnp.float32)
    q = jnp.clip(jnp.round(x * inv_scale) + zp, 0.0, QMAX)
    o_ref[...] = ((q - zp) * scale).astype(o_ref.dtype)


def _mm_kernel(x1_ref, x2_ref, o_ref, acc_ref):
    """2-D tiled matmul with f32 accumulator (shared-weight / folded-batch path)."""
    k = pl.program_id(2)

    @pl.when(k == 0)
    def _():
        acc_ref[...] = jnp.zeros_like(acc_ref)

    acc_ref[...] += jnp.dot(x1_ref[...], x2_ref[...],
                            preferred_element_type=jnp.float32)

    @pl.when(k == pl.num_programs(2) - 1)
    def _():
        o_ref[...] = acc_ref[...].astype(o_ref.dtype)


def _bmm_kernel(x1_ref, x2_ref, o_ref, acc_ref, *, packed):
    """Batched tiled matmul; `packed` packs Bt batch elements per grid step."""
    k = pl.program_id(3)

    @pl.when(k == 0)
    def _():
        acc_ref[...] = jnp.zeros_like(acc_ref)

    if packed:
        acc_ref[...] += jnp.einsum("bmk,bkn->bmn", x1_ref[...], x2_ref[...],
                                   preferred_element_type=jnp.float32)
    else:
        acc_ref[0] += jnp.dot(x1_ref[0], x2_ref[0],
                              preferred_element_type=jnp.float32)

    @pl.when(k == pl.num_programs(3) - 1)
    def _():
        o_ref[...] = acc_ref[...].astype(o_ref.dtype)


# ------------------------------ host wrappers ------------------------------ #

def _pad_flat_2d(x):
    """Flatten + pad (edge mode, keeps min/max) to a (rows, _FQ_COLS) tileable view."""
    n = x.size
    rows_needed = _cdiv(max(n, 1), _FQ_COLS)
    chunk = min(_round_up(rows_needed, 8), _FQ_MAX_ROWS)
    rows = _round_up(rows_needed, chunk)
    flat = x.reshape(-1)
    pad = rows * _FQ_COLS - n
    if pad:
        flat = jnp.pad(flat, (0, pad), mode="edge")
    return flat.reshape(rows, _FQ_COLS), chunk


def _fake_quant_per_tensor(x):
    """Dynamic per-tensor minmax fake-quant, hoisted: quantize the operand once."""
    n = x.size
    x2d, chunk = _pad_flat_2d(x)
    nchunks = x2d.shape[0] // chunk

    mn, mx = pl.pallas_call(
        _minmax_kernel,
        out_shape=(jax.ShapeDtypeStruct((1, 1), jnp.float32),
                   jax.ShapeDtypeStruct((1, 1), jnp.float32)),
        grid_spec=pltpu.PrefetchScalarGridSpec(
            num_scalar_prefetch=0,
            grid=(nchunks,),
            in_specs=[pl.BlockSpec((chunk, _FQ_COLS), lambda i: (i, 0))],
            out_specs=(pl.BlockSpec((1, 1), lambda i: (0, 0)),
                       pl.BlockSpec((1, 1), lambda i: (0, 0)))),
        compiler_params=pltpu.CompilerParams(dimension_semantics=("arbitrary",)),
    )(x2d)

    xmin, xmax = mn[0, 0], mx[0, 0]
    scale = jnp.maximum((xmax - xmin) / QMAX, CLIP_MIN)
    inv_scale = 1.0 / scale                      # reciprocal-multiply in kernel
    zp = jnp.round(-xmin * inv_scale)
    qparams = jnp.stack([scale, inv_scale, zp]).astype(jnp.float32)

    xq2d = pl.pallas_call(
        _fakequant_kernel,
        out_shape=jax.ShapeDtypeStruct(x2d.shape, x.dtype),
        grid_spec=pltpu.PrefetchScalarGridSpec(
            num_scalar_prefetch=1,
            grid=(nchunks,),
            in_specs=[pl.BlockSpec((chunk, _FQ_COLS), lambda i, qp: (i, 0))],
            out_specs=pl.BlockSpec((chunk, _FQ_COLS), lambda i, qp: (i, 0))),
        compiler_params=pltpu.CompilerParams(dimension_semantics=("parallel",)),
    )(qparams, x2d)

    return xq2d.reshape(-1)[:n].reshape(x.shape)


def _matmul_2d(a, b, out_dtype):
    M, K = a.shape
    _, N = b.shape
    Mp, tm = _pad_tile(M, 8, _MAX_TM)
    Np, tn = _pad_tile(N, 128, _MAX_TN)      # lane-dense output tiles
    Kp, tk = _pad_tile(K, 128, _MAX_TK)
    a = jnp.pad(a.astype(out_dtype), ((0, Mp - M), (0, Kp - K)))
    b = jnp.pad(b.astype(out_dtype), ((0, Kp - K), (0, Np - N)))
    out = pl.pallas_call(
        _mm_kernel,
        out_shape=jax.ShapeDtypeStruct((Mp, Np), out_dtype),
        grid_spec=pltpu.PrefetchScalarGridSpec(
            num_scalar_prefetch=0,
            grid=(Mp // tm, Np // tn, Kp // tk),
            in_specs=[pl.BlockSpec((tm, tk), lambda i, j, k: (i, k)),
                      pl.BlockSpec((tk, tn), lambda i, j, k: (k, j))],
            out_specs=pl.BlockSpec((tm, tn), lambda i, j, k: (i, j)),
            scratch_shapes=[pltpu.VMEM((tm, tn), jnp.float32)]),
        compiler_params=pltpu.CompilerParams(
            dimension_semantics=("parallel", "parallel", "arbitrary")),
    )(a, b)
    return out[:M, :N]


def _matmul_batched(a, b, out_dtype):
    B, M, K = a.shape
    _, _, N = b.shape
    Mp, tm = _pad_tile(M, 8, _MAX_TM)
    Np, tn = _pad_tile(N, 128, _MAX_TN)
    Kp, tk = _pad_tile(K, 128, _MAX_TK)
    # Pack several small per-batch matmuls per grid step (amortize per-step
    # overhead, feed the MXU more rows than M=8..64 would).
    Bt = 1
    if B > 1 and tm <= 64:
        Bt = min(B, max(1, 256 // tm))
    Bp = _round_up(B, Bt)
    a = jnp.pad(a.astype(out_dtype), ((0, Bp - B), (0, Mp - M), (0, Kp - K)))
    b = jnp.pad(b.astype(out_dtype), ((0, Bp - B), (0, Kp - K), (0, Np - N)))
    kernel = functools.partial(_bmm_kernel, packed=Bt > 1)
    out = pl.pallas_call(
        kernel,
        out_shape=jax.ShapeDtypeStruct((Bp, Mp, Np), out_dtype),
        grid_spec=pltpu.PrefetchScalarGridSpec(
            num_scalar_prefetch=0,
            grid=(Bp // Bt, Mp // tm, Np // tn, Kp // tk),
            in_specs=[pl.BlockSpec((Bt, tm, tk), lambda bb, i, j, k: (bb, i, k)),
                      pl.BlockSpec((Bt, tk, tn), lambda bb, i, j, k: (bb, k, j))],
            out_specs=pl.BlockSpec((Bt, tm, tn), lambda bb, i, j, k: (bb, i, j)),
            scratch_shapes=[pltpu.VMEM((Bt, tm, tn), jnp.float32)]),
        compiler_params=pltpu.CompilerParams(
            dimension_semantics=("parallel", "parallel", "parallel", "arbitrary")),
    )(a, b)
    return out[:B, :M, :N]


def quant_matmul(x1, x2, *, apply_quant: bool):
    M, K = x1.shape[-2:]
    K2, N = x2.shape[-2:]
    assert K == K2, (x1.shape, x2.shape)
    out_dtype = jnp.result_type(x1.dtype, x2.dtype)

    if apply_quant:
        # Hoisted: each operand is fake-quantized exactly once (per-tensor params).
        x1 = _fake_quant_per_tensor(x1)
        x2 = _fake_quant_per_tensor(x2)

    b1, b2 = x1.shape[:-2], x2.shape[:-2]
    batch = jnp.broadcast_shapes(b1, b2)
    B = math.prod(batch) if batch else 1

    x2_shared = all(d == 1 for d in b2)          # weight-like shared operand
    if x2_shared and b1 == batch:
        # Fold batch into M: no broadcast materialization, one 2-D tiled matmul.
        out = _matmul_2d(x1.reshape(B * M, K), x2.reshape(K, N), out_dtype)
        return out.reshape(batch + (M, N))

    if b1 != batch or b2 != batch:
        # Rare mixed/partial broadcast: fall back to materialization.
        x1 = jnp.broadcast_to(x1, batch + (M, K))
        x2 = jnp.broadcast_to(x2, batch + (K, N))
    out = _matmul_batched(x1.reshape(B, M, K), x2.reshape(B, K, N), out_dtype)
    return out.reshape(batch + (M, N))


class QuantMatMul:
    """JAX/Pallas port of quantize.int_matmul.QuantMatMul (dynamic per-tensor minmax)."""

    def __init__(self, disable_act_quant: bool = False):
        self.use_act_quant = False
        self.use_weight_quant = False
        self.disable_act_quant = disable_act_quant

    def set_quant_state(self, weight_quant: bool = False, act_quant: bool = False):
        self.use_weight_quant = weight_quant
        self.use_act_quant = act_quant

    def __call__(self, x1, x2):
        # TODO(synk): the optional 'pertoken' reshape branch is omitted — for the
        # default per-tensor dynamic quantizer the reshape is a no-op on the math.
        return quant_matmul(x1, x2, apply_quant=bool(self.use_act_quant))


# ----------------------------- reference (JAX) ----------------------------- #

def _fake_quant_ref(x):
    xmin, xmax = jnp.min(x), jnp.max(x)
    scale = jnp.maximum((xmax - xmin) / QMAX, CLIP_MIN)
    inv_scale = 1.0 / scale
    zp = jnp.round(-xmin * inv_scale)
    q = jnp.clip(jnp.round(x.astype(jnp.float32) * inv_scale) + zp, 0.0, QMAX)
    return ((q - zp) * scale).astype(x.dtype)


if __name__ == "__main__":
    key = jax.random.PRNGKey(0)
    k1, k2, k3 = jax.random.split(key, 3)
    # attention-style batched matmul: (B, H, M, K) @ (B, H, K, N)
    x1 = jax.random.normal(k1, (2, 4, 8, 32), dtype=jnp.float32)
    x2 = jax.random.normal(k2, (2, 4, 32, 16), dtype=jnp.float32)
    # weight-like shared operand: (K, N) broadcast over the batch
    w = jax.random.normal(k3, (32, 16), dtype=jnp.float32)

    qmm = QuantMatMul()

    # Path 1: default state (act quant off) -> plain matmul.
    out_fp = qmm(x1, x2)
    jax.block_until_ready(out_fp)
    assert out_fp.shape == (2, 4, 8, 16)
    assert jnp.allclose(out_fp, jnp.matmul(x1, x2), atol=1e-3, rtol=1e-3), \
        "fp batched path mismatch"

    out_fp_w = qmm(x1, w)
    jax.block_until_ready(out_fp_w)
    assert out_fp_w.shape == (2, 4, 8, 16)
    assert jnp.allclose(out_fp_w, jnp.matmul(x1, w), atol=1e-3, rtol=1e-3), \
        "fp folded path mismatch"

    # Path 2: act quant on -> fake-quant both operands (once each), then matmul.
    qmm.set_quant_state(weight_quant=False, act_quant=True)
    out_q = qmm(x1, x2)
    jax.block_until_ready(out_q)
    ref_q = jnp.matmul(_fake_quant_ref(x1), _fake_quant_ref(x2))
    assert jnp.allclose(out_q, ref_q, atol=2e-3, rtol=2e-3), "quant batched path mismatch"

    out_q_w = qmm(x1, w)
    jax.block_until_ready(out_q_w)
    ref_q_w = jnp.matmul(_fake_quant_ref(x1), _fake_quant_ref(w))
    assert jnp.allclose(out_q_w, ref_q_w, atol=2e-3, rtol=2e-3), "quant folded path mismatch"

    print("KERNEL_OK")
</pallas_src>

<mosaic_0001>
module attributes {stable_mosaic.version = 11 : i64} {
  func.func @_bmm_kernel(%arg0: i32, %arg1: i32, %arg2: i32, %arg3: i32, %arg4: memref<8x8x128xf32, #tpu.memory_space<vmem>>, %arg5: memref<8x128x128xf32, #tpu.memory_space<vmem>>, %arg6: memref<8x8x128xf32, #tpu.memory_space<vmem>>, %arg7: memref<8x8x128xf32, #tpu.memory_space<vmem>>) attributes {dimension_semantics = [#tpu.dimension_semantics<parallel>, #tpu.dimension_semantics<parallel>, #tpu.dimension_semantics<parallel>, #tpu.dimension_semantics<arbitrary>], iteration_bounds = array<i64: 1, 1, 1, 1>, scalar_prefetch = 0 : i64, scratch_operands = 1 : i64, tpu.core_type = #tpu.core_type<tc>, window_params = [{transform_indices = @transform_0, window_bounds = array<i64: 8, 8, 128>}, {transform_indices = @transform_1, window_bounds = array<i64: 8, 128, 128>}, {transform_indices = @transform_2, window_bounds = array<i64: 8, 8, 128>}]} {
    %c0_i32 = arith.constant 0 : i32
    %0 = arith.cmpi eq, %arg3, %c0_i32 : i32
    %1 = arith.extui %0 : i1 to i32
    %c0_i32_0 = arith.constant 0 : i32
    %2 = arith.cmpi ne, %1, %c0_i32_0 : i32
    scf.if %2 {
      %cst_14 = arith.constant 0.000000e+00 : f32
      %12 = vector.broadcast %cst_14 : f32 to vector<8x8x128xf32>
      %c0_15 = arith.constant 0 : index
      %c0_16 = arith.constant 0 : index
      %c0_17 = arith.constant 0 : index
      %13 = vector.load %arg7[%c0_15, %c0_16, %c0_17] : memref<8x8x128xf32, #tpu.memory_space<vmem>>, vector<8x8x128xf32>
      tpu.vector_store %arg7[%c0_15, %c0_16, %c0_17], %12 {strides = array<i32>} : memref<8x8x128xf32, #tpu.memory_space<vmem>>, vector<8x8x128xf32>,
    } else {
    }
    %c0 = arith.constant 0 : index
    %c0_1 = arith.constant 0 : index
    %c0_2 = arith.constant 0 : index
    %3 = vector.load %arg7[%c0, %c0_1, %c0_2] : memref<8x8x128xf32, #tpu.memory_space<vmem>>, vector<8x8x128xf32>
    %c0_3 = arith.constant 0 : index
    %c0_4 = arith.constant 0 : index
    %c0_5 = arith.constant 0 : index
    %4 = vector.load %arg4[%c0_3, %c0_4, %c0_5] : memref<8x8x128xf32, #tpu.memory_space<vmem>>, vector<8x8x128xf32>
    %c0_6 = arith.constant 0 : index
    %c0_7 = arith.constant 0 : index
    %c0_8 = arith.constant 0 : index
    %5 = vector.load %arg5[%c0_6, %c0_7, %c0_8] : memref<8x128x128xf32, #tpu.memory_space<vmem>>, vector<8x128x128xf32>
    "tpu.trace_start"() <{level = 10 : i32, message = "bmk,bkn->bmn"}> : () -> ()
    %cst = arith.constant dense<0.000000e+00> : vector<8x8x128xf32>
    %6 = tpu.matmul %4, %5, %cst {dimension_numbers = #tpu.dot_dimension_numbers<[2], [1], [1], [2], [0, 0, 0, 1, 1, 2], [0], [0]>} : vector<8x8x128xf32>, vector<8x128x128xf32>, vector<8x8x128xf32> -> vector<8x8x128xf32>
    "tpu.trace_stop"() : () -> ()
    %7 = arith.addf %3, %6 : vector<8x8x128xf32>
    %c0_9 = arith.constant 0 : index
    %c0_10 = arith.constant 0 : index
    %c0_11 = arith.constant 0 : index
    %8 = vector.load %arg7[%c0_9, %c0_10, %c0_11] : memref<8x8x128xf32, #tpu.memory_space<vmem>>, vector<8x8x128xf32>
    tpu.vector_store %arg7[%c0_9, %c0_10, %c0_11], %7 {strides = array<i32>} : memref<8x8x128xf32, #tpu.memory_space<vmem>>, vector<8x8x128xf32>,
    %c0_i32_12 = arith.constant 0 : i32
    %9 = arith.cmpi eq, %arg3, %c0_i32_12 : i32
    %10 = arith.extui %9 : i1 to i32
    %c0_i32_13 = arith.constant 0 : i32
    %11 = arith.cmpi ne, %10, %c0_i32_13 : i32
    scf.if %11 {
      %c0_14 = arith.constant 0 : index
      %c0_15 = arith.constant 0 : index
      %c0_16 = arith.constant 0 : index
      %12 = vector.load %arg7[%c0_14, %c0_15, %c0_16] : memref<8x8x128xf32, #tpu.memory_space<vmem>>, vector<8x8x128xf32>
      %c0_17 = arith.constant 0 : index
      %c0_18 = arith.constant 0 : index
      %c0_19 = arith.constant 0 : index
      %13 = vector.load %arg6[%c0_17, %c0_18, %c0_19] : memref<8x8x128xf32, #tpu.memory_space<vmem>>, vector<8x8x128xf32>
      tpu.vector_store %arg6[%c0_17, %c0_18, %c0_19], %12 {strides = array<i32>} : memref<8x8x128xf32, #tpu.memory_space<vmem>>, vector<8x8x128xf32>,
    } else {
    }
    return
  }
  func.func @transform_0(%arg0: i32, %arg1: i32, %arg2: i32, %arg3: i32) -> (i32, i32, i32) {
    %c0_i32 = arith.constant 0 : i32
    return %arg0, %arg1, %arg3 : i32, i32, i32
  }
  func.func @transform_1(%arg0: i32, %arg1: i32, %arg2: i32, %arg3: i32) -> (i32, i32, i32) {
    %c0_i32 = arith.constant 0 : i32
    return %arg0, %arg3, %arg2 : i32, i32, i32
  }
  func.func @transform_2(%arg0: i32, %arg1: i32, %arg2: i32, %arg3: i32) -> (i32, i32, i32) {
    %c0_i32 = arith.constant 0 : i32
    return %arg0, %arg1, %arg2 : i32, i32, i32
  }
}

</mosaic_0001>

<bundles_post_ra>
// kernel: tpu_custom_call.1
= control target key start
LH: loop header
LB: loop body
LE: loop exit
PB: predicated region body
PF: predicated region fallthrough
CT: control target
= control target key end

     0   :  { %7 = vsyncpa [#allocation4], 0  ;;  %s1482_s0 = inlined_call_operand.hbm [shape: f32[8,8,128], index: 0, kind: input, shape index: {}]   ;;  %s1483_s1 = inlined_call_operand.hbm [shape: f32[8,128,128], index: 1, kind: input, shape index: {}]   ;;  %s1484_s2 = inlined_call_operand.hbm [shape: f32[8,8,128], index: 2, kind: output, shape index: {}]  }
   0x1   :  { %8 = vsyncpa [#allocation7], 0 }
   0x2   :  { %9 = vsyncpa [#allocation5], 0  ;;  %s1298_s9 = smov [#allocation3]  }
   0x3   :  { %s15_s10 = sshll.u32 %s1298_s9, 4  ;;  %s16_s10 = int_to_ptr.vmem [resolvable:$true] %s15_s10 }
   0x4   :  { %s1240_s11 = scalar_lea.vmem %s16_s10, 1024  ;;  %p1245_p1 = scmp.lt.s32.totalorder %s16_s10, %s16_s10 }
   0x5   :  { %p1241_p0 = scmp.ne.s32.totalorder %s16_s10, %s1240_s11  ;;  %p1246_p2 = scmp.lt.s32.totalorder %s1240_s11, %s1240_s11 }
   0x7   :  { %p1247_p3 = por %p1246_p2, %p1245_p1 }
   0x9   :  { %p1248_p4 = pnand %p1247_p3, %p1241_p0 }
   0xb   :  { %1251 = shalt.err (!%p1248_p4)
}
   0xc   :  { %s1299_s12 = smov 128   ;;  %s1300_s13 = smov 8  }
   0xd   :  { %21 = dma.hbm_to_vmem [thread:$0]  %s1482_s0, 1024, %s16_s10, [#allocation4], %s1299_s12, %s1299_s12, %s1300_s13  }
   0xe   :  { %s1301_s16 = smov [#allocation6]  }
   0xf   :  { %s27_s17 = sshll.u32 %s1301_s16, 4  ;;  %s28_s17 = int_to_ptr.vmem [resolvable:$true] %s27_s17 }
  0x10   :  { %s1260_s18 = scalar_lea.vmem %s28_s17, 16384  ;;  %p1265_p6 = scmp.lt.s32.totalorder %s28_s17, %s28_s17 }
  0x11   :  { %p1261_p5 = scmp.ne.s32.totalorder %s28_s17, %s1260_s18  ;;  %p1266_p7 = scmp.lt.s32.totalorder %s1260_s18, %s1260_s18 }
  0x13   :  { %p1267_p8 = por %p1266_p7, %p1265_p6 }
  0x15   :  { %p1268_p9 = pnand %p1267_p8, %p1261_p5 }
  0x17   :  { %1271 = shalt.err (!%p1268_p9)
}
  0x18   :  { %33 = dma.hbm_to_vmem [thread:$0]  %s1483_s1, 16384, %s28_s17, [#allocation7], %s1299_s12, %s1299_s12, %s1300_s13  }
  0x19   :  { %1292 = dma.done.wait [#allocation4], 1024  }
  0x1a   :  { %1293 = vsyncadd [#allocation4], 4294966272 }
  0x1b   :  { %1294 = dma.done.wait [#allocation7], 16384  }
  0x1c   :  { %1295 = vsyncadd [#allocation7], 4294950912  ;;  %v1302_v0 = vmov 0.0   ;;  %vm1303_vm0 = vmmov 0   ;;  %v83_v1 = vld [vmem:[#allocation6 + $0x78] sm:$0xff]  ;;  %v82_v3 = vld [vmem:[#allocation6 + $0x70] sm:$0xff] }
  0x1d   :  { %945 = vmatprep.subr.mxu0 %v1302_v0  ;;  %980 = vmatprep.subr.mxu1 %v1302_v0  ;;  %v99_v2 = vld [vmem:[#allocation6 + $0xf8] sm:$0xff]  ;;  %v98_v4 = vld [vmem:[#allocation6 + $0xf0] sm:$0xff]  ;;  %v81_v5 = vld [vmem:[#allocation6 + $0x68] sm:$0xff]  ;;  %s1304_s0 = smov [#allocation8]  }
  0x1e   :  { %977 = vmatprep.mubr.msk.f32.mxu0 %vm1303_vm0, %v1302_v0  ;;  %1012 = vmatprep.mubr.msk.f32.mxu1 %vm1303_vm0, %v1302_v0  ;;  %v97_v6 = vld [vmem:[#allocation6 + $0xe8] sm:$0xff]  ;;  %v80_v7 = vld [vmem:[#allocation6 + $0x60] sm:$0xff]  ;;  %v79_v9 = vld [vmem:[#allocation6 + $0x58] sm:$0xff]  ;;  %s796_s1 = sshll.u32 %s1304_s0, 4  ;;  %s797_s1 = int_to_ptr.vmem [resolvable:$true] %s796_s1 }
  0x1f   :  { %946 = vmatpush3.msra.mxu0 %v83_v1  ;;  %981 = vmatpush3.msra.mxu1 %v99_v2  ;;  %v96_v8 = vld [vmem:[#allocation6 + $0xe0] sm:$0xff]  ;;  %v95_v10 = vld [vmem:[#allocation6 + $0xd8] sm:$0xff]  ;;  %v78_v11 = vld [vmem:[#allocation6 + $0x50] sm:$0xff]  ;;  %s1272_s21 = scalar_lea.vmem %s797_s1, 1024  ;;  %p1277_p11 = scmp.lt.s32.totalorder %s797_s1, %s797_s1 }
  0x20   :  { %947 = vmatprep.subr.mxu0 %v1302_v0  ;;  %982 = vmatprep.subr.mxu1 %v1302_v0  ;;  %v94_v12 = vld [vmem:[#allocation6 + $0xd0] sm:$0xff]  ;;  %v77_v13 = vld [vmem:[#allocation6 + $0x48] sm:$0xff]  ;;  %v76_v15 = vld [vmem:[#allocation6 + $0x40] sm:$0xff]  ;;  %p1273_p10 = scmp.ne.s32.totalorder %s797_s1, %s1272_s21  ;;  %p1278_p12 = scmp.lt.s32.totalorder %s1272_s21, %s1272_s21 }
  0x21   :  { %948 = vmatpush3.msra.mxu0 %v82_v3  ;;  %983 = vmatpush3.msra.mxu1 %v98_v4  ;;  %v93_v14 = vld [vmem:[#allocation6 + $0xc8] sm:$0xff]  ;;  %v92_v16 = vld [vmem:[#allocation6 + $0xc0] sm:$0xff]  ;;  %v75_v17 = vld [vmem:[#allocation6 + $0x38] sm:$0xff] }
  0x22   :  { %949 = vmatprep.subr.mxu0 %v1302_v0  ;;  %984 = vmatprep.subr.mxu1 %v1302_v0  ;;  %v91_v18 = vld [vmem:[#allocation6 + $0xb8] sm:$0xff]  ;;  %v74_v19 = vld [vmem:[#allocation6 + $0x30] sm:$0xff]  ;;  %v73_v21 = vld [vmem:[#allocation6 + $0x28] sm:$0xff]  ;;  %p1279_p13 = por %p1278_p12, %p1277_p11 }
  0x23   :  { %950 = vmatpush3.msra.mxu0 %v81_v5  ;;  %985 = vmatpush3.msra.mxu1 %v97_v6  ;;  %v90_v20 = vld [vmem:[#allocation6 + $0xb0] sm:$0xff]  ;;  %v89_v22 = vld [vmem:[#allocation6 + $0xa8] sm:$0xff]  ;;  %v72_v23 = vld [vmem:[#allocation6 + $0x20] sm:$0xff] }
  0x24   :  { %951 = vmatprep.subr.mxu0 %v1302_v0  ;;  %986 = vmatprep.subr.mxu1 %v1302_v0  ;;  %v88_v24 = vld [vmem:[#allocation6 + $0xa0] sm:$0xff]  ;;  %v71_v25 = vld [vmem:[#allocation6 + $0x18] sm:$0xff]  ;;  %v70_v27 = vld [vmem:[#allocation6 + $0x10] sm:$0xff]  ;;  %p1280_p0 = pnand %p1279_p13, %p1273_p10 }
  0x25   :  { %952 = vmatpush3.msra.mxu0 %v80_v7  ;;  %987 = vmatpush3.msra.mxu1 %v96_v8  ;;  %v87_v26 = vld [vmem:[#allocation6 + $0x98] sm:$0xff]  ;;  %v86_v28 = vld [vmem:[#allocation6 + $0x90] sm:$0xff]  ;;  %v69_v29 = vld [vmem:[#allocation6 + $0x8] sm:$0xff] }
  0x26   :  { %953 = vmatprep.subr.mxu0 %v1302_v0  ;;  %988 = vmatprep.subr.mxu1 %v1302_v0  ;;  %v85_v30 = vld [vmem:[#allocation6 + $0x88] sm:$0xff]  ;;  %v68_v31 = vld [vmem:[#allocation6] sm:$0xff]  ;;  %v115_v35 = vld [vmem:[#allocation6 + $0x178] sm:$0xff] }
  0x27   :  { %954 = vmatpush3.msra.mxu0 %v79_v9  ;;  %989 = vmatpush3.msra.mxu1 %v95_v10  ;;  %v84_v32 = vld [vmem:[#allocation6 + $0x80] sm:$0xff]  ;;  %v61_v34 = vld [vmem:[#allocation3 + $0x8] sm:$0xff]  ;;  %v131_v36 = vld [vmem:[#allocation6 + $0x1f8] sm:$0xff] }
  0x28   :  { %955 = vmatprep.subr.mxu0 %v1302_v0  ;;  %990 = vmatprep.subr.mxu1 %v1302_v0  ;;  %v60_v33 = vld [vmem:[#allocation3] sm:$0xff]  ;;  %v114_v37 = vld [vmem:[#allocation6 + $0x170] sm:$0xff]  ;;  %v113_v39 = vld [vmem:[#allocation6 + $0x168] sm:$0xff] }
  0x29   :  { %956 = vmatpush3.msra.mxu0 %v78_v11  ;;  %991 = vmatpush3.msra.mxu1 %v94_v12  ;;  %v130_v38 = vld [vmem:[#allocation6 + $0x1f0] sm:$0xff]  ;;  %v129_v40 = vld [vmem:[#allocation6 + $0x1e8] sm:$0xff]  ;;  %v112_v41 = vld [vmem:[#allocation6 + $0x160] sm:$0xff] }
  0x2a   :  { %957 = vmatprep.subr.mxu0 %v1302_v0  ;;  %992 = vmatprep.subr.mxu1 %v1302_v0  ;;  %v128_v42 = vld [vmem:[#allocation6 + $0x1e0] sm:$0xff]  ;;  %v111_v43 = vld [vmem:[#allocation6 + $0x158] sm:$0xff]  ;;  %v110_v45 = vld [vmem:[#allocation6 + $0x150] sm:$0xff] }
  0x2b   :  { %958 = vmatpush3.msra.mxu0 %v77_v13  ;;  %993 = vmatpush3.msra.mxu1 %v93_v14  ;;  %v127_v44 = vld [vmem:[#allocation6 + $0x1d8] sm:$0xff]  ;;  %v126_v46 = vld [vmem:[#allocation6 + $0x1d0] sm:$0xff]  ;;  %v109_v47 = vld [vmem:[#allocation6 + $0x148] sm:$0xff] }
  0x2c   :  { %959 = vmatprep.subr.mxu0 %v1302_v0  ;;  %994 = vmatprep.subr.mxu1 %v1302_v0  ;;  %v125_v48 = vld [vmem:[#allocation6 + $0x1c8] sm:$0xff]  ;;  %v108_v49 = vld [vmem:[#allocation6 + $0x140] sm:$0xff]  ;;  %v107_v51 = vld [vmem:[#allocation6 + $0x138] sm:$0xff] }
  0x2d   :  { %960 = vmatpush3.msra.mxu0 %v76_v15  ;;  %995 = vmatpush3.msra.mxu1 %v92_v16  ;;  %v124_v50 = vld [vmem:[#allocation6 + $0x1c0] sm:$0xff]  ;;  %v123_v52 = vld [vmem:[#allocation6 + $0x1b8] sm:$0xff]  ;;  %v106_v53 = vld [vmem:[#allocation6 + $0x130] sm:$0xff] }
  0x2e   :  { %961 = vmatprep.subr.mxu0 %v1302_v0  ;;  %996 = vmatprep.subr.mxu1 %v1302_v0  ;;  %v122_v54 = vld [vmem:[#allocation6 + $0x1b0] sm:$0xff]  ;;  %v105_v55 = vld [vmem:[#allocation6 + $0x128] sm:$0xff]  ;;  %v104_v57 = vld [vmem:[#allocation6 + $0x120] sm:$0xff] }
  0x2f   :  { %962 = vmatpush3.msra.mxu0 %v75_v17  ;;  %997 = vmatpush3.msra.mxu1 %v91_v18  ;;  %v121_v56 = vld [vmem:[#allocation6 + $0x1a8] sm:$0xff]  ;;  %v120_v58 = vld [vmem:[#allocation6 + $0x1a0] sm:$0xff]  ;;  %v103_v59 = vld [vmem:[#allocation6 + $0x118] sm:$0xff] }
  0x30   :  { %963 = vmatprep.subr.mxu0 %v1302_v0  ;;  %998 = vmatprep.subr.mxu1 %v1302_v0  ;;  %v119_v60 = vld [vmem:[#allocation6 + $0x198] sm:$0xff]  ;;  %v102_v61 = vld [vmem:[#allocation6 + $0x110] sm:$0xff]  ;;  %v101_v63 = vld [vmem:[#allocation6 + $0x108] sm:$0xff] }
  0x31   :  { %964 = vmatpush3.msra.mxu0 %v74_v19  ;;  %999 = vmatpush3.msra.mxu1 %v90_v20  ;;  %v118_v62 = vld [vmem:[#allocation6 + $0x190] sm:$0xff]  ;;  %v117_v1 = vld [vmem:[#allocation6 + $0x188] sm:$0xff]  ;;  %v100_v2 = vld [vmem:[#allocation6 + $0x100] sm:$0xff] }
  0x32   :  { %965 = vmatprep.subr.mxu0 %v1302_v0  ;;  %1000 = vmatprep.subr.mxu1 %v1302_v0  ;;  %v116_v3 = vld [vmem:[#allocation6 + $0x180] sm:$0xff]  ;;  %v62_v4 = vld [vmem:[#allocation3 + $0x10] sm:$0xff]  ;;  %v63_v5 = vld [vmem:[#allocation3 + $0x18] sm:$0xff] }
  0x33   :  { %966 = vmatpush3.msra.mxu0 %v73_v21  ;;  %1001 = vmatpush3.msra.mxu1 %v89_v22  ;;  %v147_v6 = vld [vmem:[#allocation6 + $0x278] sm:$0xff]  ;;  %v146_v8 = vld [vmem:[#allocation6 + $0x270] sm:$0xff]  ;;  %v145_v10 = vld [vmem:[#allocation6 + $0x268] sm:$0xff] }
  0x34   :  { %967 = vmatprep.subr.mxu0 %v1302_v0  ;;  %1002 = vmatprep.subr.mxu1 %v1302_v0  ;;  %v163_v7 = vld [vmem:[#allocation6 + $0x2f8] sm:$0xff]  ;;  %v162_v9 = vld [vmem:[#allocation6 + $0x2f0] sm:$0xff]  ;;  %v161_v11 = vld [vmem:[#allocation6 + $0x2e8] sm:$0xff] }
  0x35   :  { %968 = vmatpush3.msra.mxu0 %v72_v23  ;;  %1003 = vmatpush3.msra.mxu1 %v88_v24  ;;  %v144_v12 = vld [vmem:[#allocation6 + $0x260] sm:$0xff]  ;;  %v143_v14 = vld [vmem:[#allocation6 + $0x258] sm:$0xff]  ;;  %v142_v16 = vld [vmem:[#allocation6 + $0x250] sm:$0xff] }
  0x36   :  { %969 = vmatprep.subr.mxu0 %v1302_v0  ;;  %1004 = vmatprep.subr.mxu1 %v1302_v0  ;;  %v160_v13 = vld [vmem:[#allocation6 + $0x2e0] sm:$0xff]  ;;  %v159_v15 = vld [vmem:[#allocation6 + $0x2d8] sm:$0xff]  ;;  %v158_v17 = vld [vmem:[#allocation6 + $0x2d0] sm:$0xff] }
  0x37   :  { %970 = vmatpush3.msra.mxu0 %v71_v25  ;;  %1005 = vmatpush3.msra.mxu1 %v87_v26  ;;  %v141_v18 = vld [vmem:[#allocation6 + $0x248] sm:$0xff]  ;;  %v140_v20 = vld [vmem:[#allocation6 + $0x240] sm:$0xff]  ;;  %v139_v22 = vld [vmem:[#allocation6 + $0x238] sm:$0xff] }
  0x38   :  { %971 = vmatprep.subr.mxu0 %v1302_v0  ;;  %1006 = vmatprep.subr.mxu1 %v1302_v0  ;;  %v157_v19 = vld [vmem:[#allocation6 + $0x2c8] sm:$0xff]  ;;  %v156_v21 = vld [vmem:[#allocation6 + $0x2c0] sm:$0xff]  ;;  %v155_v23 = vld [vmem:[#allocation6 + $0x2b8] sm:$0xff] }
  0x39   :  { %972 = vmatpush3.msra.mxu0 %v70_v27  ;;  %1007 = vmatpush3.msra.mxu1 %v86_v28  ;;  %v138_v24 = vld [vmem:[#allocation6 + $0x230] sm:$0xff]  ;;  %v137_v26 = vld [vmem:[#allocation6 + $0x228] sm:$0xff]  ;;  %v136_v28 = vld [vmem:[#allocation6 + $0x220] sm:$0xff] }
  0x3a   :  { %973 = vmatprep.subr.mxu0 %v1302_v0  ;;  %1008 = vmatprep.subr.mxu1 %v1302_v0  ;;  %v154_v25 = vld [vmem:[#allocation6 + $0x2b0] sm:$0xff]  ;;  %v153_v27 = vld [vmem:[#allocation6 + $0x2a8] sm:$0xff] }
  0x3b   :  { %974 = vmatpush3.msra.mxu0 %v69_v29  ;;  %1009 = vmatpush3.msra.mxu1 %v85_v30  ;;  %v152_v29 = vld [vmem:[#allocation6 + $0x2a0] sm:$0xff]  ;;  %v135_v30 = vld [vmem:[#allocation6 + $0x218] sm:$0xff] }
  0x3c   :  { %975 = vmatprep.subr.mxu0 %v1302_v0  ;;  %1010 = vmatprep.subr.mxu1 %v1302_v0 }
  0x3d   :  { %976 = vmatpush3.msra.mxu0 %v68_v31  ;;  %1011 = vmatpush3.msra.mxu1 %v84_v32  ;;  %v151_v31 = vld [vmem:[#allocation6 + $0x298] sm:$0xff]  ;;  %v134_v32 = vld [vmem:[#allocation6 + $0x210] sm:$0xff] }
  0x3e   :  { %978 = vmatmul.mubr.f32.vlgmr.msra.gmra.mxu0 %v60_v33  ;;  %1013 = vmatmul.mubr.f32.vlgmr.msra.gmra.mxu1 %v61_v34  ;;  %v150_v33 = vld [vmem:[#allocation6 + $0x290] sm:$0xff]  ;;  %v133_v34 = vld [vmem:[#allocation6 + $0x208] sm:$0xff] }
  0x3f   :  { %1015 = vmatprep.subr.mxu0 %v1302_v0  ;;  %1050 = vmatprep.subr.mxu1 %v1302_v0 }
  0x40   :  { %1016 = vmatpush3.msra.mxu0 %v115_v35  ;;  %1051 = vmatpush3.msra.mxu1 %v131_v36  ;;  %v149_v35 = vld [vmem:[#allocation6 + $0x288] sm:$0xff]  ;;  %v132_v36 = vld [vmem:[#allocation6 + $0x200] sm:$0xff] }
  0x41   :  { %1017 = vmatprep.subr.mxu0 %v1302_v0  ;;  %1052 = vmatprep.subr.mxu1 %v1302_v0 }
  0x42   :  { %1018 = vmatpush3.msra.mxu0 %v114_v37  ;;  %1053 = vmatpush3.msra.mxu1 %v130_v38  ;;  %v148_v37 = vld [vmem:[#allocation6 + $0x280] sm:$0xff] }
  0x43   :  { %1019 = vmatprep.subr.mxu0 %v1302_v0  ;;  %1054 = vmatprep.subr.mxu1 %v1302_v0  ;;  %v64_v38 = vld [vmem:[#allocation3 + $0x20] sm:$0xff] }
  0x44   :  { %1020 = vmatpush3.msra.mxu0 %v113_v39  ;;  %1055 = vmatpush3.msra.mxu1 %v129_v40  ;;  %v65_v39 = vld [vmem:[#allocation3 + $0x28] sm:$0xff]  ;;  %v179_v40 = vld [vmem:[#allocation6 + $0x378] sm:$0xff] }
  0x45   :  { %1021 = vmatprep.subr.mxu0 %v1302_v0  ;;  %1056 = vmatprep.subr.mxu1 %v1302_v0 }
  0x46   :  { %1022 = vmatpush3.msra.mxu0 %v112_v41  ;;  %1057 = vmatpush3.msra.mxu1 %v128_v42  ;;  %v195_v41 = vld [vmem:[#allocation6 + $0x3f8] sm:$0xff]  ;;  %v178_v42 = vld [vmem:[#allocation6 + $0x370] sm:$0xff] }
  0x47   :  { %1023 = vmatprep.subr.mxu0 %v1302_v0  ;;  %1058 = vmatprep.subr.mxu1 %v1302_v0 }
  0x48   :  { %1024 = vmatpush3.msra.mxu0 %v111_v43  ;;  %1059 = vmatpush3.msra.mxu1 %v127_v44  ;;  %v194_v43 = vld [vmem:[#allocation6 + $0x3f0] sm:$0xff]  ;;  %v177_v44 = vld [vmem:[#allocation6 + $0x368] sm:$0xff] }
  0x49   :  { %1025 = vmatprep.subr.mxu0 %v1302_v0  ;;  %1060 = vmatprep.subr.mxu1 %v1302_v0 }
  0x4a   :  { %1026 = vmatpush3.msra.mxu0 %v110_v45  ;;  %1061 = vmatpush3.msra.mxu1 %v126_v46  ;;  %v193_v45 = vld [vmem:[#allocation6 + $0x3e8] sm:$0xff]  ;;  %v176_v46 = vld [vmem:[#allocation6 + $0x360] sm:$0xff] }
  0x4b   :  { %1027 = vmatprep.subr.mxu0 %v1302_v0  ;;  %1062 = vmatprep.subr.mxu1 %v1302_v0 }
  0x4c   :  { %1028 = vmatpush3.msra.mxu0 %v109_v47  ;;  %1063 = vmatpush3.msra.mxu1 %v125_v48  ;;  %v192_v47 = vld [vmem:[#allocation6 + $0x3e0] sm:$0xff]  ;;  %v175_v48 = vld [vmem:[#allocation6 + $0x358] sm:$0xff] }
  0x4d   :  { %1029 = vmatprep.subr.mxu0 %v1302_v0  ;;  %1064 = vmatprep.subr.mxu1 %v1302_v0 }
  0x4e   :  { %1030 = vmatpush3.msra.mxu0 %v108_v49  ;;  %1065 = vmatpush3.msra.mxu1 %v124_v50  ;;  %v191_v49 = vld [vmem:[#allocation6 + $0x3d8] sm:$0xff]  ;;  %v174_v50 = vld [vmem:[#allocation6 + $0x350] sm:$0xff] }
  0x4f   :  { %1031 = vmatprep.subr.mxu0 %v1302_v0  ;;  %1066 = vmatprep.subr.mxu1 %v1302_v0 }
  0x50   :  { %1032 = vmatpush3.msra.mxu0 %v107_v51  ;;  %1067 = vmatpush3.msra.mxu1 %v123_v52  ;;  %v190_v51 = vld [vmem:[#allocation6 + $0x3d0] sm:$0xff]  ;;  %v173_v52 = vld [vmem:[#allocation6 + $0x348] sm:$0xff] }
  0x51   :  { %1033 = vmatprep.subr.mxu0 %v1302_v0  ;;  %1068 = vmatprep.subr.mxu1 %v1302_v0 }
  0x52   :  { %1034 = vmatpush3.msra.mxu0 %v106_v53  ;;  %1069 = vmatpush3.msra.mxu1 %v122_v54  ;;  %v189_v53 = vld [vmem:[#allocation6 + $0x3c8] sm:$0xff]  ;;  %v172_v54 = vld [vmem:[#allocation6 + $0x340] sm:$0xff] }
  0x53   :  { %1035 = vmatprep.subr.mxu0 %v1302_v0  ;;  %1070 = vmatprep.subr.mxu1 %v1302_v0 }
  0x54   :  { %1036 = vmatpush3.msra.mxu0 %v105_v55  ;;  %1071 = vmatpush3.msra.mxu1 %v121_v56  ;;  %v188_v55 = vld [vmem:[#allocation6 + $0x3c0] sm:$0xff]  ;;  %v171_v56 = vld [vmem:[#allocation6 + $0x338] sm:$0xff] }
  0x55   :  { %1037 = vmatprep.subr.mxu0 %v1302_v0  ;;  %1072 = vmatprep.subr.mxu1 %v1302_v0 }
  0x56   :  { %1038 = vmatpush3.msra.mxu0 %v104_v57  ;;  %1073 = vmatpush3.msra.mxu1 %v120_v58  ;;  %v187_v57 = vld [vmem:[#allocation6 + $0x3b8] sm:$0xff]  ;;  %v170_v58 = vld [vmem:[#allocation6 + $0x330] sm:$0xff] }
  0x57   :  { %1039 = vmatprep.subr.mxu0 %v1302_v0  ;;  %1074 = vmatprep.subr.mxu1 %v1302_v0 }
  0x58   :  { %1040 = vmatpush3.msra.mxu0 %v103_v59  ;;  %1075 = vmatpush3.msra.mxu1 %v119_v60  ;;  %v186_v59 = vld [vmem:[#allocation6 + $0x3b0] sm:$0xff]  ;;  %v169_v60 = vld [vmem:[#allocation6 + $0x328] sm:$0xff] }
  0x59   :  { %1041 = vmatprep.subr.mxu0 %v1302_v0  ;;  %1076 = vmatprep.subr.mxu1 %v1302_v0 }
  0x5a   :  { %1042 = vmatpush3.msra.mxu0 %v102_v61  ;;  %1077 = vmatpush3.msra.mxu1 %v118_v62  ;;  %v185_v61 = vld [vmem:[#allocation6 + $0x3a8] sm:$0xff]  ;;  %v168_v62 = vld [vmem:[#allocation6 + $0x320] sm:$0xff] }
  0x5b   :  { %1043 = vmatprep.subr.mxu0 %v1302_v0  ;;  %1078 = vmatprep.subr.mxu1 %v1302_v0 }
  0x5c   :  { %1044 = vmatpush3.msra.mxu0 %v101_v63  ;;  %1079 = vmatpush3.msra.mxu1 %v117_v1  ;;  %v184_v63 = vld [vmem:[#allocation6 + $0x3a0] sm:$0xff]  ;;  %v167_v1 = vld [vmem:[#allocation6 + $0x318] sm:$0xff] }
  0x5d   :  { %1045 = vmatprep.subr.mxu0 %v1302_v0  ;;  %1080 = vmatprep.subr.mxu1 %v1302_v0 }
  0x5e   :  { %1046 = vmatpush3.msra.mxu0 %v100_v2  ;;  %1047 = vmatprep.mubr.msk.f32.mxu0 %vm1303_vm0, %v1302_v0  ;;  %v183_v2 = vld [vmem:[#allocation6 + $0x398] sm:$0xff] }
  0x5f   :  { %1081 = vmatpush3.msra.mxu1 %v116_v3  ;;  %1082 = vmatprep.mubr.msk.f32.mxu1 %vm1303_vm0, %v1302_v0  ;;  %v166_v3 = vld [vmem:[#allocation6 + $0x310] sm:$0xff] }
  0x60   :  { %1048 = vmatmul.mubr.f32.vlgmr.msra.gmra.mxu0 %v62_v4  ;;  %1083 = vmatmul.mubr.f32.vlgmr.msra.gmra.mxu1 %v63_v5  ;;  %v182_v4 = vld [vmem:[#allocation6 + $0x390] sm:$0xff]  ;;  %v165_v5 = vld [vmem:[#allocation6 + $0x308] sm:$0xff] }
  0x61   :  { %1085 = vmatprep.subr.mxu0 %v1302_v0  ;;  %1120 = vmatprep.subr.mxu1 %v1302_v0 }
  0x62   :  { %1086 = vmatpush3.msra.mxu0 %v147_v6  ;;  %1121 = vmatpush3.msra.mxu1 %v163_v7  ;;  %v181_v6 = vld [vmem:[#allocation6 + $0x388] sm:$0xff]  ;;  %v164_v7 = vld [vmem:[#allocation6 + $0x300] sm:$0xff] }
  0x63   :  { %1087 = vmatprep.subr.mxu0 %v1302_v0  ;;  %1122 = vmatprep.subr.mxu1 %v1302_v0 }
  0x64   :  { %1088 = vmatpush3.msra.mxu0 %v146_v8  ;;  %1123 = vmatpush3.msra.mxu1 %v162_v9  ;;  %v180_v8 = vld [vmem:[#allocation6 + $0x380] sm:$0xff]  ;;  %v66_v9 = vld [vmem:[#allocation3 + $0x30] sm:$0xff] }
  0x65   :  { %1089 = vmatprep.subr.mxu0 %v1302_v0  ;;  %1124 = vmatprep.subr.mxu1 %v1302_v0 }
  0x66   :  { %1090 = vmatpush3.msra.mxu0 %v145_v10  ;;  %1125 = vmatpush3.msra.mxu1 %v161_v11  ;;  %v67_v10 = vld [vmem:[#allocation3 + $0x38] sm:$0xff] }
  0x67   :  { %1091 = vmatprep.subr.mxu0 %v1302_v0  ;;  %1126 = vmatprep.subr.mxu1 %v1302_v0 }
  0x68   :  { %1092 = vmatpush3.msra.mxu0 %v144_v12  ;;  %1127 = vmatpush3.msra.mxu1 %v160_v13 }
  0x69   :  { %1093 = vmatprep.subr.mxu0 %v1302_v0  ;;  %1128 = vmatprep.subr.mxu1 %v1302_v0 }
  0x6a   :  { %1094 = vmatpush3.msra.mxu0 %v143_v14  ;;  %1129 = vmatpush3.msra.mxu1 %v159_v15 }
  0x6b   :  { %1095 = vmatprep.subr.mxu0 %v1302_v0  ;;  %1130 = vmatprep.subr.mxu1 %v1302_v0 }
  0x6c   :  { %1096 = vmatpush3.msra.mxu0 %v142_v16  ;;  %1131 = vmatpush3.msra.mxu1 %v158_v17 }
  0x6d   :  { %1097 = vmatprep.subr.mxu0 %v1302_v0  ;;  %1132 = vmatprep.subr.mxu1 %v1302_v0 }
  0x6e   :  { %1098 = vmatpush3.msra.mxu0 %v141_v18  ;;  %1133 = vmatpush3.msra.mxu1 %v157_v19 }
  0x6f   :  { %1099 = vmatprep.subr.mxu0 %v1302_v0  ;;  %1134 = vmatprep.subr.mxu1 %v1302_v0 }
  0x70   :  { %1100 = vmatpush3.msra.mxu0 %v140_v20  ;;  %1135 = vmatpush3.msra.mxu1 %v156_v21 }
  0x71   :  { %1101 = vmatprep.subr.mxu0 %v1302_v0  ;;  %1136 = vmatprep.subr.mxu1 %v1302_v0 }
  0x72   :  { %1102 = vmatpush3.msra.mxu0 %v139_v22  ;;  %1137 = vmatpush3.msra.mxu1 %v155_v23 }
  0x73   :  { %1103 = vmatprep.subr.mxu0 %v1302_v0  ;;  %1138 = vmatprep.subr.mxu1 %v1302_v0 }
  0x74   :  { %1104 = vmatpush3.msra.mxu0 %v138_v24  ;;  %1139 = vmatpush3.msra.mxu1 %v154_v25 }
  0x75   :  { %1105 = vmatprep.subr.mxu0 %v1302_v0  ;;  %1140 = vmatprep.subr.mxu1 %v1302_v0 }
  0x76   :  { %1106 = vmatpush3.msra.mxu0 %v137_v26  ;;  %1141 = vmatpush3.msra.mxu1 %v153_v27 }
  0x77   :  { %1107 = vmatprep.subr.mxu0 %v1302_v0  ;;  %1142 = vmatprep.subr.mxu1 %v1302_v0 }
  0x78   :  { %1108 = vmatpush3.msra.mxu0 %v136_v28  ;;  %1143 = vmatpush3.msra.mxu1 %v152_v29 }
  0x79   :  { %1109 = vmatprep.subr.mxu0 %v1302_v0  ;;  %1144 = vmatprep.subr.mxu1 %v1302_v0 }
  0x7a   :  { %1110 = vmatpush3.msra.mxu0 %v135_v30  ;;  %1145 = vmatpush3.msra.mxu1 %v151_v31 }
  0x7b   :  { %1111 = vmatprep.subr.mxu0 %v1302_v0  ;;  %1146 = vmatprep.subr.mxu1 %v1302_v0 }
  0x7c   :  { %1112 = vmatpush3.msra.mxu0 %v134_v32  ;;  %1147 = vmatpush3.msra.mxu1 %v150_v33 }
  0x7d   :  { %1113 = vmatprep.subr.mxu0 %v1302_v0  ;;  %1148 = vmatprep.subr.mxu1 %v1302_v0 }
  0x7e   :  { %1114 = vmatpush3.msra.mxu0 %v133_v34  ;;  %1149 = vmatpush3.msra.mxu1 %v149_v35 }
  0x7f   :  { %1115 = vmatprep.subr.mxu0 %v1302_v0  ;;  %1150 = vmatprep.subr.mxu1 %v1302_v0 }
  0x80   :  { %1116 = vmatpush3.msra.mxu0 %v132_v36  ;;  %1117 = vmatprep.mubr.msk.f32.mxu0 %vm1303_vm0, %v1302_v0 }
  0x81   :  { %1151 = vmatpush3.msra.mxu1 %v148_v37  ;;  %1152 = vmatprep.mubr.msk.f32.mxu1 %vm1303_vm0, %v1302_v0 }
  0x82   :  { %1118 = vmatmul.mubr.f32.vlgmr.msra.gmra.mxu0 %v64_v38  ;;  %1153 = vmatmul.mubr.f32.vlgmr.msra.gmra.mxu1 %v65_v39 }
  0x83   :  { %1155 = vmatprep.subr.mxu0 %v1302_v0  ;;  %1190 = vmatprep.subr.mxu1 %v1302_v0 }
  0x84   :  { %1156 = vmatpush3.msra.mxu0 %v179_v40  ;;  %1191 = vmatpush3.msra.mxu1 %v195_v41 }
  0x85   :  { %1157 = vmatprep.subr.mxu0 %v1302_v0  ;;  %1192 = vmatprep.subr.mxu1 %v1302_v0 }
  0x86   :  { %1158 = vmatpush3.msra.mxu0 %v178_v42  ;;  %1193 = vmatpush3.msra.mxu1 %v194_v43 }
  0x87   :  { %1159 = vmatprep.subr.mxu0 %v1302_v0  ;;  %1194 = vmatprep.subr.mxu1 %v1302_v0 }
  0x88   :  { %1160 = vmatpush3.msra.mxu0 %v177_v44  ;;  %1195 = vmatpush3.msra.mxu1 %v193_v45 }
  0x89   :  { %1161 = vmatprep.subr.mxu0 %v1302_v0  ;;  %1196 = vmatprep.subr.mxu1 %v1302_v0 }
  0x8a   :  { %1162 = vmatpush3.msra.mxu0 %v176_v46  ;;  %1197 = vmatpush3.msra.mxu1 %v192_v47 }
  0x8b   :  { %1163 = vmatprep.subr.mxu0 %v1302_v0  ;;  %1198 = vmatprep.subr.mxu1 %v1302_v0 }
  0x8c   :  { %1164 = vmatpush3.msra.mxu0 %v175_v48  ;;  %1199 = vmatpush3.msra.mxu1 %v191_v49 }
  0x8d   :  { %1165 = vmatprep.subr.mxu0 %v1302_v0  ;;  %1200 = vmatprep.subr.mxu1 %v1302_v0 }
  0x8e   :  { %1166 = vmatpush3.msra.mxu0 %v174_v50  ;;  %1201 = vmatpush3.msra.mxu1 %v190_v51 }
  0x8f   :  { %1167 = vmatprep.subr.mxu0 %v1302_v0  ;;  %1202 = vmatprep.subr.mxu1 %v1302_v0 }
  0x90   :  { %1168 = vmatpush3.msra.mxu0 %v173_v52  ;;  %1203 = vmatpush3.msra.mxu1 %v189_v53 }
  0x91   :  { %1169 = vmatprep.subr.mxu0 %v1302_v0  ;;  %1204 = vmatprep.subr.mxu1 %v1302_v0 }
  0x92   :  { %1170 = vmatpush3.msra.mxu0 %v172_v54  ;;  %1205 = vmatpush3.msra.mxu1 %v188_v55 }
  0x93   :  { %1171 = vmatprep.subr.mxu0 %v1302_v0  ;;  %1206 = vmatprep.subr.mxu1 %v1302_v0 }
  0x94   :  { %1172 = vmatpush3.msra.mxu0 %v171_v56  ;;  %1207 = vmatpush3.msra.mxu1 %v187_v57 }
  0x95   :  { %1173 = vmatprep.subr.mxu0 %v1302_v0  ;;  %1208 = vmatprep.subr.mxu1 %v1302_v0 }
  0x96   :  { %1174 = vmatpush3.msra.mxu0 %v170_v58  ;;  %1209 = vmatpush3.msra.mxu1 %v186_v59 }
  0x97   :  { %1175 = vmatprep.subr.mxu0 %v1302_v0  ;;  %1210 = vmatprep.subr.mxu1 %v1302_v0 }
  0x98   :  { %1176 = vmatpush3.msra.mxu0 %v169_v60  ;;  %1211 = vmatpush3.msra.mxu1 %v185_v61 }
  0x99   :  { %1177 = vmatprep.subr.mxu0 %v1302_v0  ;;  %1212 = vmatprep.subr.mxu1 %v1302_v0 }
  0x9a   :  { %1178 = vmatpush3.msra.mxu0 %v168_v62  ;;  %1213 = vmatpush3.msra.mxu1 %v184_v63 }
  0x9b   :  { %1179 = vmatprep.subr.mxu0 %v1302_v0  ;;  %1214 = vmatprep.subr.mxu1 %v1302_v0 }
  0x9c   :  { %1180 = vmatpush3.msra.mxu0 %v167_v1  ;;  %1215 = vmatpush3.msra.mxu1 %v183_v2 }
  0x9d   :  { %1181 = vmatprep.subr.mxu0 %v1302_v0  ;;  %1216 = vmatprep.subr.mxu1 %v1302_v0 }
  0x9e   :  { %1182 = vmatpush3.msra.mxu0 %v166_v3  ;;  %1217 = vmatpush3.msra.mxu1 %v182_v4 }
  0x9f   :  { %1183 = vmatprep.subr.mxu0 %v1302_v0  ;;  %1218 = vmatprep.subr.mxu1 %v1302_v0 }
  0xa0   :  { %1184 = vmatpush3.msra.mxu0 %v165_v5  ;;  %1219 = vmatpush3.msra.mxu1 %v181_v6 }
  0xa1   :  { %1185 = vmatprep.subr.mxu0 %v1302_v0  ;;  %1220 = vmatprep.subr.mxu1 %v1302_v0 }
  0xa2   :  { %1186 = vmatpush3.msra.mxu0 %v164_v7  ;;  %1187 = vmatprep.mubr.msk.f32.mxu0 %vm1303_vm0, %v1302_v0 }
  0xa3   :  { %1221 = vmatpush3.msra.mxu1 %v180_v8  ;;  %1222 = vmatprep.mubr.msk.f32.mxu1 %vm1303_vm0, %v1302_v0 }
  0xa4   :  { %1188 = vmatmul.mubr.f32.vlgmr.msra.gmra.mxu0 %v66_v9  ;;  %1223 = vmatmul.mubr.f32.vlgmr.msra.gmra.mxu1 %v67_v10 }
  0xfe   :  { %v262_v11 = vpop.f32.mrf.mxu0  ;;  %v332_v12 = vpop.f32.mrf.mxu1 }
  0xff   :  { %783 = vst [vmem:[#allocation8] sm:$0xff] %v262_v11  ;;  %784 = vst [vmem:[#allocation8 + $0x8] sm:$0xff] %v332_v12 }
 0x100   :  { %v979_v13 = vpop.f32.mrf.mxu0  ;;  %v1014_v14 = vpop.f32.mrf.mxu1 }
 0x120   :  { %v402_v15 = vpop.f32.mrf.mxu0  ;;  %v472_v16 = vpop.f32.mrf.mxu1 }
 0x121   :  { %785 = vst [vmem:[#allocation8 + $0x10] sm:$0xff] %v402_v15  ;;  %786 = vst [vmem:[#allocation8 + $0x18] sm:$0xff] %v472_v16 }
 0x122   :  { %v1049_v17 = vpop.f32.mrf.mxu0  ;;  %v1084_v18 = vpop.f32.mrf.mxu1 }
 0x142   :  { %v542_v19 = vpop.f32.mrf.mxu0  ;;  %v612_v20 = vpop.f32.mrf.mxu1 }
 0x143   :  { %787 = vst [vmem:[#allocation8 + $0x20] sm:$0xff] %v542_v19  ;;  %788 = vst [vmem:[#allocation8 + $0x28] sm:$0xff] %v612_v20 }
 0x144   :  { %v1119_v21 = vpop.f32.mrf.mxu0  ;;  %v1154_v0 = vpop.f32.mrf.mxu1 }
 0x164   :  { %v682_v22 = vpop.f32.mrf.mxu0  ;;  %v752_v23 = vpop.f32.mrf.mxu1 }
 0x165   :  { %789 = vst [vmem:[#allocation8 + $0x30] sm:$0xff] %v682_v22  ;;  %790 = vst [vmem:[#allocation8 + $0x38] sm:$0xff] %v752_v23 }
 0x166   :  { %v1189_v24 = vpop.f32.mrf.mxu0  ;;  %v1224_v25 = vpop.f32.mrf.mxu1 }
 0x167   :  { %1283 = shalt.err (!%p1280_p0)
}
 0x168   :  { %802 = dma.vmem_to_hbm [thread:$0]  %s797_s1, 1024, %s1484_s2, [#allocation5], %s1299_s12, %s1299_s12, %s1300_s13  }
 0x169   :  { %1296 = dma.done.wait [#allocation5], 1024  }
 0x16a   :  { %1297 = vsyncadd [#allocation5], 4294966272 }
 0x16b   :  { %806 = vsyncpa [#allocation4], 1 }
 0x16c   :  { %807 = vsyncpa [#allocation7], 1 }
 0x16d   :  { %808 = vsyncpa [#allocation5], 1 }

</bundles_post_ra>
